<compile_context>
chip_gen: v6e
topology: v6e:2x2x1
jax: 0.10.0
libtpu: 0.0.40
codegen_flags: <defaults>
</compile_context>

<pallas_src>
import math

import jax
import jax.numpy as jnp
from jax.experimental import pallas as pl
from jax.experimental.pallas import tpu as pltpu


# ----------------------------- Pallas kernel ---------------------------------------

def _layer_scale_kernel(x_ref, g_ref, o_ref):
    # x_ref: (block_rows, block_cols), g_ref: (1, block_cols) -> VPU broadcast multiply.
    o_ref[...] = (x_ref[...] * g_ref[...]).astype(o_ref.dtype)


# ----------------------------- wrapper ----------------------------------------------

def _round_up(v, m):
    return -(-v // m) * m


def layer_scale(x, gamma, *, max_block_rows=4096, vmem_budget_bytes=24 << 20):
    """LayerScale forward: x * gamma, gamma broadcast over the last dim of x."""
    orig_shape = x.shape
    dim = orig_shape[-1]
    assert gamma.shape == (dim,), (gamma.shape, dim)

    rows = int(math.prod(orig_shape[:-1])) if len(orig_shape) > 1 else 1

    itemsize = jnp.dtype(x.dtype).itemsize
    sublane = {4: 8, 2: 16, 1: 32}.get(itemsize, 8)   # rows per packed vreg sublane
    LANE = 128

    # ---- lane folding: make the last (lane) axis a multiple of 128 so output stores
    # are unmasked full-width vst. x becomes (rows/k, k*dim), gamma tiled k times;
    # the elementwise multiply is unchanged.
    fold = 1
    if dim % LANE != 0:
        k0 = LANE // math.gcd(dim, LANE)
        if k0 > 1 and rows % k0 == 0:
            fold = k0
    rows_f = rows // fold
    dim_f = dim * fold

    x2 = x.reshape(rows_f, dim_f)
    # gamma cast to x.dtype (matches a torch module whose parameter dtype == x.dtype).
    g2 = jnp.tile(gamma.astype(x.dtype), fold).reshape(1, dim_f)

    # ---- column (lane) tiling: full width by default; split in multiples of 128 only
    # when a single sublane-height stripe of the full width would blow the VMEM budget
    # (4 buffers = double-buffered input + double-buffered output).
    block_cols = dim_f
    if dim_f % LANE == 0 and 4 * sublane * dim_f * itemsize > vmem_budget_bytes:
        max_cols = max(LANE,
                       (vmem_budget_bytes // (4 * sublane * itemsize)) // LANE * LANE)
        block_cols = min(dim_f, max_cols)

    # ---- row tiling: biggest multiple-of-sublane block that fits the budget, then
    # split so the parallel row grid has an even number (>= 2) of steps to keep both
    # v7x TensorCores busy (harmless on single-TC v5e/v6e).
    bytes_per_row = block_cols * itemsize * 4
    budget_rows = max(sublane, vmem_budget_bytes // max(bytes_per_row, 1))
    block_rows = min(max_block_rows, budget_rows, rows_f)
    if block_rows < rows_f:
        block_rows = max(sublane, (block_rows // sublane) * sublane)
    if rows_f > sublane:
        n_blocks = max(2, pl.cdiv(rows_f, block_rows))
        if n_blocks % 2:
            n_blocks += 1
        block_rows = min(rows_f, _round_up(pl.cdiv(rows_f, n_blocks), sublane))

    grid = (pl.cdiv(rows_f, block_rows), pl.cdiv(dim_f, block_cols))

    cost = pl.CostEstimate(
        flops=rows_f * dim_f,
        transcendentals=0,
        bytes_accessed=2 * rows_f * dim_f * itemsize + dim_f * itemsize,
    )

    out = pl.pallas_call(
        _layer_scale_kernel,
        out_shape=jax.ShapeDtypeStruct((rows_f, dim_f), x.dtype),
        grid_spec=pltpu.PrefetchScalarGridSpec(
            num_scalar_prefetch=0,
            grid=grid,
            in_specs=[
                pl.BlockSpec((block_rows, block_cols), lambda i, j: (i, j)),
                pl.BlockSpec((1, block_cols), lambda i, j: (0, j)),  # gamma resident over rows
            ],
            out_specs=pl.BlockSpec((block_rows, block_cols), lambda i, j: (i, j)),
        ),
        compiler_params=pltpu.CompilerParams(
            dimension_semantics=("parallel", "parallel"),
            # Let the compiler use the requested tiles + headroom; stays well under
            # 64 MiB physical per-TC VMEM on v7x and 128 MiB on v5e/v6e.
            vmem_limit_bytes=min(vmem_budget_bytes + (8 << 20), 48 << 20),
        ),
        cost_estimate=cost,
    )(x2, g2)

    return out.reshape(orig_shape)


# ----------------------------- main --------------------------------------------------

if __name__ == "__main__":
    init_values = 1e-5
    key = jax.random.PRNGKey(0)
    fwd = jax.jit(layer_scale)

    # Case 1: ViT-like, lane-dense dim (384 = 3 * 128). batch=2, seq=8, dim=384.
    B, S, D = 2, 8, 384
    k1, k2, k3, k4 = jax.random.split(key, 4)
    x = jax.random.normal(k1, (B, S, D), jnp.float32)
    gamma = init_values * jnp.ones((D,), jnp.float32) \
        + 1e-6 * jax.random.normal(k2, (D,), jnp.float32)
    out = fwd(x, gamma)
    jax.block_until_ready(out)
    ref = x * gamma
    assert out.shape == x.shape
    assert bool(jnp.all(jnp.isfinite(out)))
    assert bool(jnp.allclose(out, ref, rtol=1e-6, atol=1e-6)), "mismatch (case 1)"

    # Case 2: non-multiple-of-128 dim exercises the lane-folding path. (4, 16, 48).
    B2, S2, D2 = 4, 16, 48
    x2 = jax.random.normal(k3, (B2, S2, D2), jnp.float32)
    gamma2 = init_values * jnp.ones((D2,), jnp.float32) \
        + 1e-6 * jax.random.normal(k4, (D2,), jnp.float32)
    out2 = fwd(x2, gamma2)
    jax.block_until_ready(out2)
    ref2 = x2 * gamma2
    assert out2.shape == x2.shape
    assert bool(jnp.allclose(out2, ref2, rtol=1e-6, atol=1e-6)), "mismatch (case 2)"

    print("KERNEL_OK")
</pallas_src>

<mosaic_0001>
module attributes {stable_mosaic.version = 11 : i64} {
  func.func @_layer_scale_kernel(%arg0: i32, %arg1: i32, %arg2: memref<8x384xf32, #tpu.memory_space<vmem>>, %arg3: memref<1x384xf32, #tpu.memory_space<vmem>>, %arg4: memref<8x384xf32, #tpu.memory_space<vmem>>) attributes {dimension_semantics = [#tpu.dimension_semantics<parallel>, #tpu.dimension_semantics<parallel>], iteration_bounds = array<i64: 2, 1>, scalar_prefetch = 0 : i64, scratch_operands = 0 : i64, tpu.core_type = #tpu.core_type<tc>, window_params = [{transform_indices = @transform_0, window_bounds = array<i64: 8, 384>}, {transform_indices = @transform_1, window_bounds = array<i64: 1, 384>}, {transform_indices = @transform_2, window_bounds = array<i64: 8, 384>}]} {
    %c0 = arith.constant 0 : index
    %c0_0 = arith.constant 0 : index
    %0 = vector.load %arg2[%c0, %c0_0] : memref<8x384xf32, #tpu.memory_space<vmem>>, vector<8x384xf32>
    %c0_1 = arith.constant 0 : index
    %c0_2 = arith.constant 0 : index
    %1 = vector.load %arg3[%c0_1, %c0_2] : memref<1x384xf32, #tpu.memory_space<vmem>>, vector<1x384xf32>
    %2 = vector.broadcast %1 : vector<1x384xf32> to vector<8x384xf32>
    %3 = arith.mulf %0, %2 : vector<8x384xf32>
    %c0_3 = arith.constant 0 : index
    %c0_4 = arith.constant 0 : index
    %4 = vector.load %arg4[%c0_3, %c0_4] : memref<8x384xf32, #tpu.memory_space<vmem>>, vector<8x384xf32>
    tpu.vector_store %arg4[%c0_3, %c0_4], %3 {strides = array<i32>} : memref<8x384xf32, #tpu.memory_space<vmem>>, vector<8x384xf32>,
    return
  }
  func.func @transform_0(%arg0: i32, %arg1: i32) -> (i32, i32) {
    %c0_i32 = arith.constant 0 : i32
    return %arg0, %arg1 : i32, i32
  }
  func.func @transform_1(%arg0: i32, %arg1: i32) -> (i32, i32) {
    %c0_i32 = arith.constant 0 : i32
    %c0_i32_0 = arith.constant 0 : i32
    return %c0_i32, %arg1 : i32, i32
  }
  func.func @transform_2(%arg0: i32, %arg1: i32) -> (i32, i32) {
    %c0_i32 = arith.constant 0 : i32
    return %arg0, %arg1 : i32, i32
  }
}

</mosaic_0001>

<bundles_post_ra>
// kernel: tile.1
= control target key start
LH: loop header
LB: loop body
LE: loop exit
PB: predicated region body
PF: predicated region fallthrough
CT: control target
= control target key end

     0   :  { %2 = vsyncpa [#allocation1], 0  ;;  %s75_s0 = inlined_call_operand.hbm [shape: f32[384], index: 0, kind: input, shape index: {}]   ;;  %s76_s1 = inlined_call_operand.vmem [shape: f32[1,384], index: 1, kind: output, shape index: {}]  }
   0x1   :  { %7 = vsyncadd [#allocation1], 64  ;;  %s52_s6 = smov [#allocation0]  }
   0x2   :  { %s9_s7 = sshll.u32 %s52_s6, 4  ;;  %s10_s7 = int_to_ptr.vmem [resolvable:$true] %s9_s7 }
   0x3   :  { %s38_s8 = scalar_lea.vmem %s10_s7, 64  ;;  %s42_s9 = scalar_lea.vmem %s10_s7, 128 }
   0x4   :  { %p39_p0 = scmp.ne.s32.totalorder %s10_s7, %s38_s8  ;;  %p43_p1 = scmp.lt.s32.totalorder %s10_s7, %s10_s7 }
   0x5   :  { %p44_p2 = scmp.lt.s32.totalorder %s42_s9, %s38_s8 }
   0x7   :  { %p45_p3 = por %p44_p2, %p43_p1 }
   0x9   :  { %p46_p4 = pnand %p45_p3, %p39_p0 }
   0xb   :  { %49 = shalt.err (!%p46_p4)
}
   0xc   :  { %12 = dma.hbm_to_vmem [thread:$0]  %s75_s0, 64, %s10_s7, [#allocation1]  }
   0xd   :  { %50 = dma.done.wait [#allocation1], 128  }
   0xe   :  { %51 = vsyncadd [#allocation1], 4294967168  ;;  %v16_v0 = vld [vmem:[#allocation0] ss:$0 sm:$0xff]  ;;  %v19_v1 = vld [vmem:[#allocation0 + $0x1] ss:$0 sm:$0xff] }
   0xf   :  { %v23_v2 = vld [vmem:[#allocation0 + $0x2] ss:$0 sm:$0xff]  ;;  %17 = vst [vmem:[%s76_s1] sm:$0x1] %v16_v0  ;;  %27 = vst [vmem:[%s76_s1 + $0x1] sm:$0x1] %v19_v1 }
  0x10   :  { %28 = vst [vmem:[%s76_s1 + $0x2] sm:$0x1] %v23_v2 }
  0x11   :  { %26 = vsyncpa [#allocation1], 1 }

// kernel: layer_scale.1
= control target key start
LH: loop header
LB: loop body
LE: loop exit
PB: predicated region body
PF: predicated region fallthrough
CT: control target
= control target key end

     0   :  { %7 = vsyncpa [#allocation3], 0  ;;  %s688_s0 = inlined_call_operand.hbm [shape: f32[16,384], index: 0, kind: input, shape index: {}]   ;;  %s689_s1 = inlined_call_operand.vmem [shape: f32[1,384], index: 1, kind: input, shape index: {}]   ;;  %s690_s2 = inlined_call_operand.hbm [shape: f32[16,384], index: 2, kind: output, shape index: {}]  }
   0x1   :  { %9 = vsyncpa [#allocation3 + $0x1], 0 }
   0x2   :  { %10 = vsyncpa [#allocation4], 0 }
   0x3   :  { %12 = vsyncpa [#allocation4 + $0x1], 0  ;;  %s541_s9 = smov 0   ;;  %s543_s10 = smov 0  }
   0x4   :  { %s545_s11 = smov 0   ;;  %s547_s12 = smov 0  }
   0x5   :  { %s549_s13 = smov 0   ;;  %s551_s14 = smov 0  }
   0x6 LB: > { %s338_s15 = sadd.s32 4294967295, %s522_s14   ;;  %s339_s16 = sadd.s32 4294967294, %s522_s14   ;;  %s522_s14 = sphi %s551_s14, %s18_s14   ;;  %s518_s13 = sphi %s549_s13, %s702_s13   ;;  %s514_s12 = sphi %s547_s12, %s701_s12   ;;  %s510_s11 = sphi %s545_s11, %s700_s11   ;;  %s506_s10 = sphi %s543_s10, %s699_s10   ;;  %s502_s9 = sphi %s541_s9, %s698_s9  }
   0x7   : > { %s30_s17 = sadd.s32 1, %s518_s13  ;;  %s39_s18 = sadd.s32 1, %s510_s11 }
   0x8   : > { %p32_p0 = scmp.ge.s32.totalorder %s30_s17, 2  ;;  %p46_p1 = scmp.ne.s32.totalorder %s510_s11, %s506_s10 }
   0x9   : > { %p47_p2 = scmp.eq.s32.totalorder %s522_s14, 0  ;;  %p52_p3 = scmp.ne.s32.totalorder %s506_s10, %s502_s9 }
   0xa   : > { %s704_s17 = smov (%p32_p0, %s30_s17), 0  ;;  %p53_p5 = scmp.eq.s32.totalorder %s338_s15, 0 }
   0xb   : > { %p582_p4 = por %p47_p2, %p46_p1  ;;  %s34_s20 = ssub.s32 %s518_s13, %s704_s17 }
   0xc   : > { %p104_p6 = scmp.eq.s32.totalorder %s338_s15, 1  ;;  %p37_p7 = scmp.eq.s32.totalorder %s34_s20, 0 }
   0xd   : > { %p588_p8 = por %p53_p5, %p52_p3  ;;  %p110_p10 = scmp.eq.s32.totalorder %s339_s16, 1 }
   0xe   : > { %p592_p9 = por %p104_p6, %p46_p1  ;;  %p364_p13 = scmp.lt.s32.totalorder %s522_s14, 2 }
   0xf   : > { %s597_s23 = scalar_select %p37_p7, %s510_s11, %s39_s18  }
  0x10   : > { %p599_p11 = por %p110_p10, %p52_p3  ;;  %s138_s25 = sand.u32 1, %s510_s11  }
  0x11   : > { %s348_s26 = smul.u32 24, %s138_s25  ;;  %p609_p0 = pnand %p364_p13, %p582_p4 }
  0x12   : > { %s694_s24 = scalar_select %p599_p11, 1, 0 }
  0x13   : > { %s349_s27 = smul.u32 384, %s518_s13  ;;  %p344_p1 = scmp.ge.s32.totalorder %s522_s14, 1 }
  0x14   : > { %s142_s4 = scalar_lea.vmem [#allocation2], %s348_s26  ;;  %s139_s6 = scalar_lea.sflag [#allocation3], %s138_s25 }
  0x15   : > { %s150_s3 = scalar_lea.hbm %s688_s0, %s349_s27  ;;  %s152_s5 = sshll.u32 %s142_s4, 4  ;;  %s153_s5 = int_to_ptr.vmem [resolvable:$true] %s152_s5 }
  0x16   : > { %p416_p2 = pneg %p609_p0  ;;  %s427_s7 = scalar_lea.vmem %s153_s5, 384 }
  0x17   : > { %p428_p3 = scmp.ne.s32.totalorder %s153_s5, %s427_s7  ;;  %s524_s8 = smov [#allocation2]  }
  0x18   : > { %s432_s15 = sshll.u32 %s524_s8, 4  ;;  %s433_s15 = int_to_ptr.vmem [resolvable:$false] %s432_s15 }
  0x19   : > { %p430_p5 = pnand %p428_p3, %p416_p2  ;;  %s434_s16 = scalar_lea.vmem %s433_s15, 768 }
  0x1a   : > { %p435_p4 = scmp.lt.s32.totalorder %s153_s5, %s433_s15  ;;  %p436_p7 = scmp.lt.s32.totalorder %s434_s16, %s427_s7 }
  0x1b   : > { %p431_p6 = pneg %p430_p5 }
  0x1c   : > { %p437_p10 = por %p436_p7, %p435_p4 }
  0x1e   : > { %p438_p13 = pnand %p437_p10, %p431_p6 }
  0x20   : > { %441 = shalt.err (!%p438_p13)
}
  0x21   : > { %359 = dma.hbm_to_vmem [thread:$0]  (!%p609_p0), %s150_s3, 384, %s153_s5, %s139_s6  }
  0x22   : > { %p157_p12 = scmp.lt.s32.totalorder %s522_s14, 3 }
  0x24   : > { %p158_p11 = pnand %p344_p1, %p157_p12 }
  0x25   : > { %s625_s18 = sand.u32 (!%p158_p11), 1, %s506_s10  }
  0x26   : > { %161 = sbr.rel (%p158_p11) target bundleno = 68 (0x44), region = 28  ;;  %s164_s20 = scalar_lea.sflag (!%p158_p11), [#allocation3], %s625_s18 }
  0x27   : > { %s350_s19 = smul.u32 (!%p158_p11), 24, %s625_s18 }
  0x29   : > { %s167_s25 = scalar_lea.vmem (!%p158_p11), [#allocation2], %s350_s19 }
  0x2b   : > { %493 = dma.done.wait (%p588_p8), %s164_s20, 384  }
  0x2c   : > { %495 = vsyncadd (%p588_p8), %s164_s20, 4294966912  ;;  %v204_v0 = vlaneseq  ;;  %s351_s26 = smul.u32 384, %s514_s12  ;;  %v199_v5 = vld [vmem:[%s167_s25] sm:$0xff]  ;;  %s191_s29 = scalar_lea.vmem [#allocation5], %s350_s19  ;;  %v200_v7 = vld [vmem:[%s167_s25 + $0x8] sm:$0xff] }
  0x2d   : > { %v202_v6 = vld [vmem:[%s689_s1] sm:$0x7]  ;;  %s242_s30 = sshll.u32 %s191_s29, 4  ;;  %v201_v10 = vld [vmem:[%s167_s25 + $0x10] sm:$0xff]  ;;  %s226_s4 = scalar_lea.sflag [#allocation4], %s625_s18  ;;  %s637_s30 = int_to_ptr.vmem [resolvable:$true] %s242_s30 }
  0x2e   : > { %v205_v1 = vshrl.u32 %v204_v0, 7  ;;  %s642_s3 = scalar_lea.hbm %s690_s2, %s351_s26  ;;  %s442_s5 = scalar_lea.vmem %s637_s30, 384 }
  0x2f   : > { %p443_p8 = scmp.ne.s32.totalorder %s637_s30, %s442_s5  ;;  %s525_s6 = smov [#allocation5]  }
  0x30   : > { %v206_v2 = vsub.s32 0, %v205_v1  ;;  %v210_v3 = vsub.s32 1, %v205_v1  ;;  %v214_v4 = vsub.s32 2, %v205_v1  ;;  %s446_s7 = sshll.u32 %s525_s6, 4  ;;  %s447_s7 = int_to_ptr.vmem [resolvable:$false] %s446_s7 }
  0x31   : > { %p444_p11 = pnand %p443_p8, %p592_p9  ;;  %s448_s8 = scalar_lea.vmem %s447_s7, 768 }
  0x32   : > { %v207_v8 = vrot.slane %v202_v6, %v206_v2  ;;  %v211_v9 = vrot.slane %v202_v6, %v210_v3  ;;  %v215_v11 = vrot.slane %v202_v6, %v214_v4  ;;  %p449_p0 = scmp.lt.s32.totalorder %s637_s30, %s447_s7  ;;  %p450_p1 = scmp.lt.s32.totalorder %s448_s8, %s442_s5 }
  0x33   : > { %p445_p12 = pneg %p444_p11 }
  0x34   : > { %v219_v12 = vmul.f32 %v207_v8, %v199_v5  ;;  %v220_v13 = vmul.f32 %v211_v9, %v200_v7  ;;  %v221_v14 = vmul.f32 %v215_v11, %v201_v10  ;;  %p451_p2 = por %p450_p1, %p449_p0 }
  0x36   : > { %222 = vst [vmem:[%s191_s29] sm:$0xff] %v219_v12  ;;  %223 = vst [vmem:[%s191_s29 + $0x8] sm:$0xff] %v220_v13  ;;  %p452_p3 = pnand %p451_p2, %p445_p12 }
  0x37   : > { %224 = vst [vmem:[%s191_s29 + $0x10] sm:$0xff] %v221_v14 }
  0x38   : > { %455 = shalt.err (!%p452_p3)
}
  0x39   : > { %s456_s15 = scalar_lea.hbm %s642_s3, 384  ;;  %s460_s19 = scalar_lea.hbm %s690_s2, 768 }
  0x3a   : > { %p457_p5 = scmp.ne.s32.totalorder %s642_s3, %s456_s15  ;;  %p461_p7 = scmp.lt.s32.totalorder %s642_s3, %s690_s2 }
  0x3b   : > { %p462_p10 = scmp.lt.s32.totalorder %s460_s19, %s456_s15 }
  0x3c   : > { %p458_p6 = pnand %p457_p5, %p592_p9 }
  0x3d   : > { %p463_p13 = por %p462_p10, %p461_p7 }
  0x3e   : > { %p459_p4 = pneg %p458_p6 }
  0x40   : > { %p464_p8 = pnand %p463_p13, %p459_p4 }
  0x42   : > { %467 = shalt.err (!%p464_p8)
}
  0x43   : > { %354 = dma.vmem_to_hbm [thread:$0]  (%p592_p9), %s637_s30, 384, %s642_s3, %s226_s4  }
  0x44 PF: > { %s254_s26 = sand.u32 1, %s502_s9   ;;  %p696_p11 = scmp.ne.s32.totalorder %s694_s24, 0 }
  0x45   : > { %p697_p12 = scmp.ge.s32.totalorder %s522_s14, 2  ;;  %s255_s27 = scalar_lea.sflag [#allocation4], %s254_s26 }
  0x47   : > { %p361_p0 = pnand %p697_p12, %p696_p11 }
  0x49   : > { %p362_p1 = pneg %p361_p0 }
  0x4b   : > { %497 = dma.done.wait (%p362_p1), %s255_s27, 384  }
  0x4c   : > { %499 = vsyncadd (%p362_p1), %s255_s27, 4294966912  ;;  %s18_s14 = sadd.s32 1, %s522_s14   ;;  %s698_s9 = smov %s506_s10 }
  0x4d   : > { %p15_p2 = scmp.ge.s32.totalorder %s18_s14, 4   ;;  %s699_s10 = smov %s510_s11 }
  0x4e   : > { %s700_s11 = smov %s597_s23  ;;  %s701_s12 = smov %s518_s13 }
  0x4f   : > { %s702_s13 = smov %s704_s17  ;;  %17 = sbr.rel (!%p15_p2) target bundleno = 6 (0x6), region = 76 }
  0x54   :  { %260 = vsyncpa [#allocation3], 1 }
  0x55   :  { %262 = vsyncpa [#allocation3 + $0x1], 1 }
  0x56   :  { %263 = vsyncpa [#allocation4], 1 }
  0x57   :  { %265 = vsyncpa [#allocation4 + $0x1], 1 }

</bundles_post_ra>
